<compile_context>
chip_gen: v6e
topology: v6e:2x2x1
jax: 0.10.0
libtpu: 0.0.40
codegen_flags: <defaults>
</compile_context>

<pallas_src>
import functools

import jax
import jax.numpy as jnp
from jax import lax
from jax.experimental import pallas as pl
from jax.experimental.pallas import tpu as pltpu


def _round_up(n, m):
    return ((n + m - 1) // m) * m


def _friendly_kernel(n_outputs, training, *refs):
    if training:
        x_ref, w1_ref, w2_ref, mask_ref, o_ref = refs
    else:
        x_ref, w1_ref, w2_ref, o_ref = refs

    # fc1 (no bias): bf16 operands, f32 accumulation -> MXU.
    h = jnp.dot(x_ref[...], w1_ref[...], preferred_element_type=jnp.float32)

    # Dropout(p=0.5): pre-scaled inverted-dropout mask (values 0.0 / 2.0),
    # single vmul per tile (scale folded into the mask).
    if training:
        h = h * mask_ref[...].astype(jnp.float32)

    # ReLU -> VPU (f32).
    h = jnp.maximum(h, 0.0)

    # fc2 (no bias): cast to bf16 only at the dot; accumulate in f32.
    logits = jnp.dot(h.astype(jnp.bfloat16), w2_ref[...],
                     preferred_element_type=jnp.float32)

    # Padded lane columns would contribute exp(0)=1 to the softmax denominator;
    # mask them to -inf (static check, compiled away when no padding).
    n_out_pad = logits.shape[-1]
    if n_outputs < n_out_pad:
        col = lax.broadcasted_iota(jnp.int32, logits.shape, 1)
        logits = jnp.where(col < n_outputs, logits, -jnp.inf)

    # Numerically stable softmax over the last dim (f32); one divide per row,
    # then a broadcast multiply.
    m = jnp.max(logits, axis=-1, keepdims=True)
    e = jnp.exp(logits - m)
    denom = jnp.sum(e, axis=-1, keepdims=True)
    o_ref[...] = (e * (1.0 / denom)).astype(o_ref.dtype)


def prepare_params(w1, w2):
    """One-time prep: transpose, zero-pad to 128-lane multiples, cast to bf16.

    Kept out of the per-step hot path so no transpose/pad/cast is re-emitted
    on every forward call.
    """
    n_hidden, n_inputs = w1.shape
    n_outputs, _ = w2.shape
    n_in_p = _round_up(n_inputs, 128)
    n_hid_p = _round_up(n_hidden, 128)
    n_out_p = _round_up(n_outputs, 128)

    w1t = jnp.zeros((n_in_p, n_hid_p), jnp.bfloat16)
    w1t = w1t.at[:n_inputs, :n_hidden].set(jnp.asarray(w1).T.astype(jnp.bfloat16))
    w2t = jnp.zeros((n_hid_p, n_out_p), jnp.bfloat16)
    w2t = w2t.at[:n_hidden, :n_outputs].set(jnp.asarray(w2).T.astype(jnp.bfloat16))

    dims = dict(n_inputs=n_inputs, n_hidden=n_hidden, n_outputs=n_outputs,
                n_in_p=n_in_p, n_hid_p=n_hid_p, n_out_p=n_out_p)
    return w1t, w2t, dims


def friendly_nn_forward(x, w1t, w2t, dims, *, training=False, dropout_key=None):
    """x: (batch, n_inputs) f32; w1t/w2t: padded bf16 params from prepare_params."""
    batch, n_inputs = x.shape
    assert n_inputs == dims["n_inputs"]
    n_outputs = dims["n_outputs"]
    n_in_p, n_hid_p, n_out_p = dims["n_in_p"], dims["n_hid_p"], dims["n_out_p"]

    # Batch tile: 256 rows (fits v7x's 64 MiB VMEM with large headroom, good
    # MXU M-dim), or the whole 8-aligned batch when smaller than one tile.
    if batch >= 256:
        tm = 256
    elif batch >= 128:
        tm = 128
    else:
        tm = _round_up(batch, 8)
    batch_p = _round_up(batch, tm)
    grid = (batch_p // tm,)

    # Pad + cast activations once at the boundary (lane-dense, bf16 MXU feed).
    x_p = jnp.zeros((batch_p, n_in_p), jnp.bfloat16)
    x_p = x_p.at[:batch, :n_inputs].set(x.astype(jnp.bfloat16))

    in_specs = [
        pl.BlockSpec((tm, n_in_p), lambda i: (i, 0)),        # x tile (streamed)
        pl.BlockSpec((n_in_p, n_hid_p), lambda i: (0, 0)),   # w1^T resident
        pl.BlockSpec((n_hid_p, n_out_p), lambda i: (0, 0)),  # w2^T resident
    ]
    args = [x_p, w1t, w2t]

    mask_bytes = 0
    if training:
        if dropout_key is None:
            dropout_key = jax.random.PRNGKey(0)
        keep = jax.random.bernoulli(dropout_key, 0.5, (batch_p, n_hid_p))
        mask = keep.astype(jnp.bfloat16) * jnp.bfloat16(2.0)  # pre-scaled {0, 2}
        in_specs.append(pl.BlockSpec((tm, n_hid_p), lambda i: (i, 0)))
        args.append(mask)
        mask_bytes = batch_p * n_hid_p * 2

    cost = pl.CostEstimate(
        flops=2 * batch_p * (n_in_p + n_out_p) * n_hid_p,
        transcendentals=batch_p * n_out_p,
        bytes_accessed=(x_p.size * 2 + w1t.size * 2 + w2t.size * 2
                        + mask_bytes + batch_p * n_out_p * 4),
    )

    out = pl.pallas_call(
        functools.partial(_friendly_kernel, n_outputs, training),
        out_shape=jax.ShapeDtypeStruct((batch_p, n_out_p), x.dtype),
        grid=grid,
        in_specs=in_specs,
        out_specs=pl.BlockSpec((tm, n_out_p), lambda i: (i, 0)),
        compiler_params=pltpu.CompilerParams(
            dimension_semantics=("parallel",)),
        cost_estimate=cost,
    )(*args)

    return out[:batch, :n_outputs]


if __name__ == "__main__":
    # Small shapes implied by the module: X is (batch, n_inputs).
    batch, n_inputs, n_hidden, n_outputs = 8, 32, 64, 16

    key = jax.random.PRNGKey(0)
    kx, k1, k2, kd = jax.random.split(key, 4)

    x = jax.random.normal(kx, (batch, n_inputs), dtype=jnp.float32)
    # Deterministic "Kaiming-uniform-like" init for the two Linear weights.
    b1 = 1.0 / jnp.sqrt(n_inputs)
    b2 = 1.0 / jnp.sqrt(n_hidden)
    w1 = jax.random.uniform(k1, (n_hidden, n_inputs), jnp.float32, -b1, b1)
    w2 = jax.random.uniform(k2, (n_outputs, n_hidden), jnp.float32, -b2, b2)

    # One-time parameter prep (transpose / pad / bf16 cast).
    w1t, w2t, dims = prepare_params(w1, w2)

    # Eval mode (dropout = identity): deterministic check vs pure-JAX ref.
    out = jax.block_until_ready(
        friendly_nn_forward(x, w1t, w2t, dims, training=False))

    # Reference with the same bf16-operand / f32-accumulation matmuls.
    x_bf = x.astype(jnp.bfloat16)
    w1t_bf = jnp.asarray(w1).T.astype(jnp.bfloat16)
    w2t_bf = jnp.asarray(w2).T.astype(jnp.bfloat16)
    h_ref = jnp.maximum(
        jnp.dot(x_bf, w1t_bf, preferred_element_type=jnp.float32), 0.0)
    logits_ref = jnp.dot(h_ref.astype(jnp.bfloat16), w2t_bf,
                         preferred_element_type=jnp.float32)
    ref = jax.nn.softmax(logits_ref, axis=-1)

    assert out.shape == (batch, n_outputs)
    assert jnp.allclose(out, ref, atol=2e-3, rtol=2e-3), \
        float(jnp.max(jnp.abs(out - ref)))
    assert jnp.allclose(jnp.sum(out, axis=-1), 1.0, atol=1e-3)

    # Training-mode path (precomputed inverted-dropout mask streamed per tile).
    out_train = jax.block_until_ready(
        friendly_nn_forward(x, w1t, w2t, dims, training=True, dropout_key=kd))
    assert out_train.shape == (batch, n_outputs)
    assert jnp.allclose(jnp.sum(out_train, axis=-1), 1.0, atol=1e-3)

    print("KERNEL_OK")
</pallas_src>

<mosaic_0001>
module attributes {stable_mosaic.version = 11 : i64} {
  func.func @_friendly_kernel(%arg0: i32, %arg1: memref<8x128xbf16, #tpu.memory_space<vmem>>, %arg2: memref<128x128xbf16, #tpu.memory_space<vmem>>, %arg3: memref<128x128xbf16, #tpu.memory_space<vmem>>, %arg4: memref<8x128xf32, #tpu.memory_space<vmem>>) attributes {dimension_semantics = [#tpu.dimension_semantics<parallel>], iteration_bounds = array<i64: 1>, scalar_prefetch = 0 : i64, scratch_operands = 0 : i64, tpu.core_type = #tpu.core_type<tc>, window_params = [{transform_indices = @transform_0, window_bounds = array<i64: 8, 128>}, {pipeline_mode = #tpu.pipeline_mode<synchronous>, transform_indices = @transform_1, window_bounds = array<i64: 128, 128>}, {pipeline_mode = #tpu.pipeline_mode<synchronous>, transform_indices = @transform_2, window_bounds = array<i64: 128, 128>}, {transform_indices = @transform_3, window_bounds = array<i64: 8, 128>}]} {
    %c0 = arith.constant 0 : index
    %c0_0 = arith.constant 0 : index
    %0 = vector.load %arg1[%c0, %c0_0] : memref<8x128xbf16, #tpu.memory_space<vmem>>, vector<8x128xbf16>
    %c0_1 = arith.constant 0 : index
    %c0_2 = arith.constant 0 : index
    %1 = vector.load %arg2[%c0_1, %c0_2] : memref<128x128xbf16, #tpu.memory_space<vmem>>, vector<128x128xbf16>
    %cst = arith.constant dense<0.000000e+00> : vector<8x128xf32>
    %2 = tpu.matmul %0, %1, %cst {dimension_numbers = #tpu.dot_dimension_numbers<[1], [0], [0], [1], [0, 0, 1, 1], [], []>} : vector<8x128xbf16>, vector<128x128xbf16>, vector<8x128xf32> -> vector<8x128xf32>
    %cst_3 = arith.constant 0.000000e+00 : f32
    %3 = vector.broadcast %cst_3 : f32 to vector<8x128xf32>
    %4 = arith.maximumf %2, %3 : vector<8x128xf32>
    %5 = arith.truncf %4 : vector<8x128xf32> to vector<8x128xbf16>
    %c0_4 = arith.constant 0 : index
    %c0_5 = arith.constant 0 : index
    %6 = vector.load %arg3[%c0_4, %c0_5] : memref<128x128xbf16, #tpu.memory_space<vmem>>, vector<128x128xbf16>
    %cst_6 = arith.constant dense<0.000000e+00> : vector<8x128xf32>
    %7 = tpu.matmul %5, %6, %cst_6 {dimension_numbers = #tpu.dot_dimension_numbers<[1], [0], [0], [1], [0, 0, 1, 1], [], []>} : vector<8x128xbf16>, vector<128x128xbf16>, vector<8x128xf32> -> vector<8x128xf32>
    %8 = tpu.iota {dimensions = array<i32: 1>} : vector<8x128xi32>
    %c16_i32 = arith.constant 16 : i32
    %9 = vector.broadcast %c16_i32 : i32 to vector<8x128xi32>
    %10 = arith.cmpi slt, %8, %9 : vector<8x128xi32>
    %cst_7 = arith.constant 0xFF800000 : f32
    %11 = vector.broadcast %cst_7 : f32 to vector<8x128xf32>
    %12 = arith.select %10, %7, %11 : vector<8x128xi1>, vector<8x128xf32>
    %cst_8 = arith.constant dense<0xFF800000> : vector<8xf32>
    %13 = vector.multi_reduction <maximumf>, %12, %cst_8 [1] : vector<8x128xf32> to vector<8xf32>
    %14 = vector.shape_cast %13 : vector<8xf32> to vector<8x1xf32>
    %15 = vector.broadcast %14 : vector<8x1xf32> to vector<8x128xf32>
    %16 = arith.subf %12, %15 : vector<8x128xf32>
    %17 = math.exp %16 : vector<8x128xf32>
    %cst_9 = arith.constant dense<0.000000e+00> : vector<8xf32>
    %18 = vector.multi_reduction <add>, %17, %cst_9 [1] : vector<8x128xf32> to vector<8xf32>
    %19 = vector.shape_cast %18 : vector<8xf32> to vector<8x1xf32>
    %cst_10 = arith.constant 1.000000e+00 : f32
    %20 = vector.broadcast %cst_10 : f32 to vector<8x1xf32>
    %21 = arith.divf %20, %19 : vector<8x1xf32>
    %22 = vector.broadcast %21 : vector<8x1xf32> to vector<8x128xf32>
    %23 = arith.mulf %17, %22 : vector<8x128xf32>
    %c0_11 = arith.constant 0 : index
    %c0_12 = arith.constant 0 : index
    %24 = vector.load %arg4[%c0_11, %c0_12] : memref<8x128xf32, #tpu.memory_space<vmem>>, vector<8x128xf32>
    tpu.vector_store %arg4[%c0_11, %c0_12], %23 {strides = array<i32>} : memref<8x128xf32, #tpu.memory_space<vmem>>, vector<8x128xf32>,
    return
  }
  func.func @transform_0(%arg0: i32) -> (i32, i32) {
    %c0_i32 = arith.constant 0 : i32
    %c0_i32_0 = arith.constant 0 : i32
    return %arg0, %c0_i32 : i32, i32
  }
  func.func @transform_1(%arg0: i32) -> (i32, i32) {
    %c0_i32 = arith.constant 0 : i32
    %c0_i32_0 = arith.constant 0 : i32
    %c0_i32_1 = arith.constant 0 : i32
    return %c0_i32, %c0_i32_0 : i32, i32
  }
  func.func @transform_2(%arg0: i32) -> (i32, i32) {
    %c0_i32 = arith.constant 0 : i32
    %c0_i32_0 = arith.constant 0 : i32
    %c0_i32_1 = arith.constant 0 : i32
    return %c0_i32, %c0_i32_0 : i32, i32
  }
  func.func @transform_3(%arg0: i32) -> (i32, i32) {
    %c0_i32 = arith.constant 0 : i32
    %c0_i32_0 = arith.constant 0 : i32
    return %arg0, %c0_i32 : i32, i32
  }
}

</mosaic_0001>

<bundles_post_ra>
// kernel: tpu_custom_call.1
= control target key start
LH: loop header
LB: loop body
LE: loop exit
PB: predicated region body
PF: predicated region fallthrough
CT: control target
= control target key end

     0   :  { %8 = vsyncpa [#allocation3], 0  ;;  %s525_s0 = inlined_call_operand.hbm [shape: bf16[8,128], index: 0, kind: input, shape index: {}]   ;;  %s526_s1 = inlined_call_operand.hbm [shape: bf16[128,128], index: 1, kind: input, shape index: {}]   ;;  %s527_s2 = inlined_call_operand.hbm [shape: bf16[128,128], index: 2, kind: input, shape index: {}]   ;;  %s528_s3 = inlined_call_operand.hbm [shape: f32[8,128], index: 3, kind: output, shape index: {}]  }
   0x1   :  { %9 = vsyncpa [#allocation6], 0 }
   0x2   :  { %10 = vsyncpa [#allocation4], 0  ;;  %s485_s12 = smov [#allocation5]  }
   0x3   :  { %s26_s13 = sshll.u32 %s485_s12, 4  ;;  %s27_s13 = int_to_ptr.vmem [resolvable:$true] %s26_s13 }
   0x4   :  { %s407_s14 = scalar_lea.vmem %s27_s13, 1024  ;;  %p412_p1 = scmp.lt.s32.totalorder %s27_s13, %s27_s13 }
   0x5   :  { %p408_p0 = scmp.ne.s32.totalorder %s27_s13, %s407_s14  ;;  %p413_p2 = scmp.lt.s32.totalorder %s407_s14, %s407_s14 }
   0x7   :  { %p414_p3 = por %p413_p2, %p412_p1 }
   0x9   :  { %p415_p4 = pnand %p414_p3, %p408_p0 }
   0xb   :  { %418 = shalt.err (!%p415_p4)
}
   0xc   :  { %s486_s15 = smov 64   ;;  %s487_s16 = smov 4  }
   0xd   :  { %32 = dma.hbm_to_vmem [thread:$0]  %s526_s1, 1024, %s27_s13, [#allocation6], %s486_s15, %s486_s15, %s487_s16  }
   0xe   :  { %s488_s19 = smov [#allocation2]   ;;  %s489_s21 = smov [#allocation7]  }
   0xf   :  { %s17_s20 = sshll.u32 %s488_s19, 4  ;;  %s38_s22 = sshll.u32 %s489_s21, 4  ;;  %s18_s20 = int_to_ptr.vmem [resolvable:$true] %s17_s20  ;;  %s39_s22 = int_to_ptr.vmem [resolvable:$true] %s38_s22 }
  0x10   :  { %s427_s23 = scalar_lea.vmem %s18_s20, 64  ;;  %p432_p6 = scmp.lt.s32.totalorder %s18_s20, %s18_s20 }
  0x11   :  { %p428_p5 = scmp.ne.s32.totalorder %s18_s20, %s427_s23  ;;  %p433_p7 = scmp.lt.s32.totalorder %s427_s23, %s427_s23 }
  0x13   :  { %p434_p8 = por %p433_p7, %p432_p6 }
  0x15   :  { %p435_p9 = pnand %p434_p8, %p428_p5 }
  0x17   :  { %438 = shalt.err (!%p435_p9)
}
  0x18   :  { %20 = dma.hbm_to_vmem [thread:$0]  %s525_s0, 64, %s18_s20, [#allocation3]  }
  0x19   :  { %s447_s26 = scalar_lea.vmem %s39_s22, 1024  ;;  %p452_p11 = scmp.lt.s32.totalorder %s39_s22, %s39_s22 }
  0x1a   :  { %p448_p10 = scmp.ne.s32.totalorder %s39_s22, %s447_s26  ;;  %p453_p12 = scmp.lt.s32.totalorder %s447_s26, %s447_s26 }
  0x1c   :  { %p454_p13 = por %p453_p12, %p452_p11 }
  0x1e   :  { %p455_p0 = pnand %p454_p13, %p448_p10 }
  0x20   :  { %458 = shalt.err (!%p455_p0)
}
  0x21   :  { %44 = dma.hbm_to_vmem [thread:$0]  %s527_s2, 1024, %s39_s22, [#allocation6], %s486_s15, %s486_s15, %s487_s16  }
  0x22   :  { %479 = dma.done.wait [#allocation3], 64  }
  0x23   :  { %480 = vsyncadd [#allocation3], 4294967232 }
  0x24   :  { %481 = dma.done.wait [#allocation6], 2048  }
  0x25   :  { %482 = vsyncadd [#allocation6], 4294965248  ;;  %v490_v0 = vmov 0.0   ;;  %vm491_vm0 = vmmov 0   ;;  %v379_v1 = vld [vmem:[#allocation5 + $0x38] sm:$0xff]   ;;  %v380_v2 = vld [vmem:[#allocation5 + $0x30] sm:$0xff]   ;;  %v266_v24 = vlaneseq }
  0x26   :  { %331 = vmatprep.subr.bf16.mxu0 %v490_v0  ;;  %347 = vmatprep.mubr.msk.bf16.mxu0 %vm491_vm0, %v490_v0  ;;  %v381_v3 = vld [vmem:[#allocation5 + $0x28] sm:$0xff]   ;;  %v387_v4 = vld [vmem:[#allocation7 + $0x38] sm:$0xff]   ;;  %v382_v5 = vld [vmem:[#allocation5 + $0x20] sm:$0xff]   ;;  %s492_s0 = smov [#allocation8]  }
  0x27   :  { %351 = vmatprep.subr.bf16.mxu1 %v490_v0  ;;  %367 = vmatprep.mubr.msk.bf16.mxu1 %vm491_vm0, %v490_v0  ;;  %v388_v6 = vld [vmem:[#allocation7 + $0x30] sm:$0xff]   ;;  %v383_v7 = vld [vmem:[#allocation5 + $0x18] sm:$0xff]   ;;  %v389_v8 = vld [vmem:[#allocation7 + $0x28] sm:$0xff]   ;;  %v267_v25 = vand.u32 127, %v266_v24  ;;  %s287_s2 = sshll.u32 %s492_s0, 4  ;;  %s288_s2 = int_to_ptr.vmem [resolvable:$true] %s287_s2 }
  0x28   :  { %332 = vmatpush3.bf16.msra.mxu0 %v379_v1  ;;  %352 = vmatpush3.bf16.msra.mxu1 %v387_v4  ;;  %v384_v9 = vld [vmem:[#allocation5 + $0x10] sm:$0xff]   ;;  %v390_v10 = vld [vmem:[#allocation7 + $0x20] sm:$0xff]   ;;  %v385_v11 = vld [vmem:[#allocation5 + $0x8] sm:$0xff]   ;;  %s459_s28 = scalar_lea.vmem %s288_s2, 128  ;;  %p464_p2 = scmp.lt.s32.totalorder %s288_s2, %s288_s2 }
  0x29   :  { %333 = vmatprep.subr.bf16.mxu0 %v490_v0  ;;  %353 = vmatprep.subr.bf16.mxu1 %v490_v0  ;;  %v391_v12 = vld [vmem:[#allocation7 + $0x18] sm:$0xff]   ;;  %v386_v13 = vld [vmem:[#allocation5] sm:$0xff]   ;;  %v392_v14 = vld [vmem:[#allocation7 + $0x10] sm:$0xff]   ;;  %vm268_vm1 = vcmp.lt.s32.totalorder %v267_v25, 16  ;;  %p460_p1 = scmp.ne.s32.totalorder %s288_s2, %s459_s28  ;;  %p465_p3 = scmp.lt.s32.totalorder %s459_s28, %s459_s28 }
  0x2a   :  { %v55_v15 = vld [vmem:[#allocation2] sm:$0xf]  ;;  %v393_v16 = vld [vmem:[#allocation7 + $0x8] sm:$0xff]   ;;  %v394_v17 = vld [vmem:[#allocation7] sm:$0xff]  }
  0x2b   :  { %p466_p4 = por %p465_p3, %p464_p2 }
  0x2c   :  { %334 = vmatpush3.bf16.msra.mxu0 %v380_v2  ;;  %354 = vmatpush3.bf16.msra.mxu1 %v388_v6 }
  0x2d   :  { %335 = vmatprep.subr.bf16.mxu0 %v490_v0  ;;  %355 = vmatprep.subr.bf16.mxu1 %v490_v0  ;;  %p467_p5 = pnand %p466_p4, %p460_p1 }
  0x30   :  { %336 = vmatpush3.bf16.msra.mxu0 %v381_v3  ;;  %356 = vmatpush3.bf16.msra.mxu1 %v389_v8 }
  0x31   :  { %337 = vmatprep.subr.bf16.mxu0 %v490_v0  ;;  %357 = vmatprep.subr.bf16.mxu1 %v490_v0 }
  0x34   :  { %338 = vmatpush3.bf16.msra.mxu0 %v382_v5  ;;  %358 = vmatpush3.bf16.msra.mxu1 %v390_v10 }
  0x35   :  { %339 = vmatprep.subr.bf16.mxu0 %v490_v0  ;;  %359 = vmatprep.subr.bf16.mxu1 %v490_v0 }
  0x38   :  { %340 = vmatpush3.bf16.msra.mxu0 %v383_v7  ;;  %360 = vmatpush3.bf16.msra.mxu1 %v391_v12 }
  0x39   :  { %341 = vmatprep.subr.bf16.mxu0 %v490_v0  ;;  %361 = vmatprep.subr.bf16.mxu1 %v490_v0 }
  0x3c   :  { %342 = vmatpush3.bf16.msra.mxu0 %v384_v9  ;;  %362 = vmatpush3.bf16.msra.mxu1 %v392_v14 }
  0x3d   :  { %343 = vmatprep.subr.bf16.mxu0 %v490_v0  ;;  %363 = vmatprep.subr.bf16.mxu1 %v490_v0 }
  0x40   :  { %344 = vmatpush3.bf16.msra.mxu0 %v385_v11  ;;  %364 = vmatpush3.bf16.msra.mxu1 %v393_v16 }
  0x41   :  { %345 = vmatprep.subr.bf16.mxu0 %v490_v0  ;;  %365 = vmatprep.subr.bf16.mxu1 %v490_v0 }
  0x44   :  { %346 = vmatpush3.bf16.msra.mxu0 %v386_v13  ;;  %366 = vmatpush3.bf16.msra.mxu1 %v394_v17 }
  0x47   :  { %348 = vmatmul.mubr.bf16.vlgmr.msra.gmra.mxu0 %v55_v15 }
 0x107   :  { %v154_v18 = vpop.f32.mrf.mxu0 }
 0x108   :  { %v160_v19 = vmax.f32 %v154_v18, 0.0 }
 0x109   :  { %v349_v20 = vpop.f32.mrf.mxu0 }
 0x10a   :  { %v161_v21 = vpack.c.bf16 %v160_v19, %v160_v19 }
 0x10b   :  { %v157_v22 = vpop.f32.mrf.mxu0 }
 0x10c   :  { %368 = vmatmul.mubr.bf16.vlgmr.msra.gmra.mxu1 %v161_v21 }
 0x10d   :  { %v350_v23 = vpop.f32.mrf.mxu0 }
 0x1cc   :  { %v260_v26 = vpop.f32.mrf.mxu1 }
 0x1cd   :  { %v269_v27 = vsel %vm268_vm1, %v260_v26, -inf }
 0x1ce   :  { %270 = vmax.xlane.f32.xlu0 %v269_v27  ;;  %v369_v28 = vpop.f32.mrf.mxu1 }
 0x1d0   :  { %v263_v29 = vpop.f32.mrf.mxu1 }
 0x1d2   :  { %v370_v30 = vpop.f32.mrf.mxu1 }
 0x257   :  { %v271_v31 = vpop.xlane.xlu0 %270 }
 0x258   :  { %v272_v32 = vsub.f32 %v269_v27, %v271_v31 }
 0x25a   :  { %v273_v33 = vmul.f32 1.442695, %v272_v32 }
 0x25c   :  { %395 = vpow2.f32 %v273_v33 }
 0x269   :  { %v396_v34 = vpop.eup %395 }
 0x26a   :  { %275 = vadd.xlane.f32.xlu0 %v396_v34 }
 0x2f3   :  { %v276_v35 = vpop.xlane.xlu0 %275 }
 0x2f4   :  { %397 = vrcp.f32 %v276_v35 }
 0x301   :  { %v398_v36 = vpop.eup %397 }
 0x302   :  { %v279_v37 = vmul.f32 %v398_v36, %v396_v34 }
 0x304   :  { %280 = vst [vmem:[#allocation8] sm:$0xff] %v279_v37 }
 0x305   :  { %470 = shalt.err (!%p467_p5)
}
 0x306   :  { %290 = dma.vmem_to_hbm [thread:$0]  %s288_s2, 128, %s528_s3, [#allocation4]  }
 0x307   :  { %483 = dma.done.wait [#allocation4], 128  }
 0x308   :  { %484 = vsyncadd [#allocation4], 4294967168 }
 0x309   :  { %294 = vsyncpa [#allocation3], 1 }
 0x30a   :  { %295 = vsyncpa [#allocation6], 1 }
 0x30b   :  { %296 = vsyncpa [#allocation4], 1 }

</bundles_post_ra>
